<compile_context>
chip_gen: v7x
topology: tpu7x:2x2x1
jax: 0.10.0
libtpu: 0.0.40
codegen_flags: <defaults>
</compile_context>

<pallas_src>
import functools
import math

import jax
import jax.numpy as jnp
from jax.experimental import pallas as pl
from jax.experimental.pallas import tpu as pltpu


def _round_up(x, m):
    return ((x + m - 1) // m) * m


def _kernel_config():
    """Generation-aware knobs, resolved at trace time."""
    try:
        kind = jax.devices()[0].device_kind.lower()
    except Exception:  # defensive: fall back to conservative settings
        kind = ""
    is_v7 = "v7" in kind
    big_vmem = ("v5" in kind) or ("v6" in kind)          # 128 MiB physical VMEM
    return {
        "tanh_bf16": ("v6" in kind) or is_v7,            # bf16 EUP path exists
        "vmem_limit": (64 if big_vmem else 32) * 1024 * 1024,
        "tb_target": 4096 if is_v7 else 8192,            # fat tiles amortize ~0.35us/step
        "min_steps": 4 if is_v7 else 2,                  # v7x: >=2 steps per TensorCore
    }


def _choose_batch_tile(B, NI, H, x_itemsize, actor_itemsize, cfg):
    """Largest batch tile that (a) fits a conservative VMEM budget, (b) keeps
    >= min_steps grid steps at large B (megacore + pipeline overlap), and (c)
    satisfies the (8,128) block constraints: a multiple of 128 when splitting,
    or exactly B (block dim == full array dim) when not."""
    H2 = 2 * H
    row_bytes = (
        2 * NI * x_itemsize + 2 * NI              # x tile (double-buffered) + bf16 copy
        + 2 * 2 * H * actor_itemsize + 2 * 4      # actor / value output tiles (double-buffered)
        + 4 * H2 + 2 * H2 + 4 * H2                # pre1/h1 (f32 + bf16) + h2a/h2c (f32)
    )
    tb_vmem_cap = max(128, (12 * 1024 * 1024 // row_bytes) // 128 * 128)
    tb_cap = min(cfg["tb_target"], tb_vmem_cap)
    if B <= min(1024, tb_cap):
        return B                                  # single full block, no padding anywhere
    return min(tb_cap, max(128, _round_up(pl.cdiv(B, cfg["min_steps"]), 128)))


def _mlp_base_kernel(x_ref, w1_ref, b1_ref, w2a_ref, b2a_ref, w2c_ref, b2c_ref,
                     clw_ref, clb_ref, value_ref, actor_ref,
                     *, hidden_size, tanh_bf16):
    H = hidden_size
    bf16 = jnp.bfloat16

    # x arrives in its stored dtype; cast to bf16 here (removes the wrapper's
    # extra HBM pass over x).
    x = x_ref[...].astype(bf16)                                       # (TB, NI)

    # Fused actor|critic layer 1: one (TB, NI) @ (NI, 2H) MXU call, f32 acc.
    pre1 = jnp.dot(x, w1_ref[...], preferred_element_type=jnp.float32) + b1_ref[...]
    pre1a, pre1c = pre1[:, :H], pre1[:, H:]
    if tanh_bf16:   # v6e / v7x: bf16 EUP path (~2x element rate)
        h1a, h1c = jnp.tanh(pre1a.astype(bf16)), jnp.tanh(pre1c.astype(bf16))
    else:           # v5e / v4: no bf16 VPU/EUP path -> keep f32, cast for MXU
        h1a, h1c = jnp.tanh(pre1a).astype(bf16), jnp.tanh(pre1c).astype(bf16)

    # Layer 2 as two (H, H) matmuls: no block-diagonal zero MACs, no (2H, 2H)
    # resident weight; layer-2 tanh stays f32 because it feeds the value head.
    h2a = jnp.tanh(jnp.dot(h1a, w2a_ref[...], preferred_element_type=jnp.float32)
                   + b2a_ref[...])                                    # (TB, H)
    h2c = jnp.tanh(jnp.dot(h1c, w2c_ref[...], preferred_element_type=jnp.float32)
                   + b2c_ref[...])                                    # (TB, H)

    actor_ref[...] = h2a.astype(actor_ref.dtype)   # bf16 writeback: dominant HBM term halved

    # critic_linear (out_features=1) as a per-row VPU/XLU reduction; bias is an
    # SMEM scalar.
    # TODO(synk): a lane-dense (1, TB) value store would drop the per-row masked
    # vst's, but the (TB,1)->(1,TB) relayout is the one op here with real Mosaic
    # lowering risk and the value writeback is only 4 B/row, so (TB,1) f32 kept.
    value = jnp.sum(h2c * clw_ref[...], axis=-1, keepdims=True) + clb_ref[0, 0]
    value_ref[...] = value.astype(value_ref.dtype)                    # (TB, 1)


@functools.partial(jax.jit, static_argnames=("actor_dtype",))
def mlp_base_forward(x, params, rnn_hxs, actor_dtype=jnp.bfloat16):
    """MLPBase forward.  Returns (value (B,1) f32, hidden_actor (B,H) actor_dtype, rnn_hxs)."""
    B, NI = x.shape
    H = params["aw2"].shape[1]
    H2 = 2 * H
    f32, bf16 = jnp.float32, jnp.bfloat16

    cfg = _kernel_config()
    TB = _choose_batch_tile(B, NI, H, x.dtype.itemsize,
                            jnp.dtype(actor_dtype).itemsize, cfg)
    G = pl.cdiv(B, TB)

    # --- pack parameters (a few KB; single tiny XLA fusion) ---
    w1 = jnp.concatenate([params["aw1"], params["cw1"]], axis=1).astype(bf16)   # (NI, 2H)
    b1 = jnp.concatenate([params["ab1"], params["cb1"]], axis=1).astype(f32)    # (1, 2H)
    w2a = params["aw2"].astype(bf16)                                            # (H, H)
    w2c = params["cw2"].astype(bf16)                                            # (H, H)
    b2a = params["ab2"].astype(f32)                                             # (1, H)
    b2c = params["cb2"].astype(f32)                                             # (1, H)
    clw = params["clw"].astype(f32).T                                           # (1, H)  (free bitcast)
    clb = params["clb"].astype(f32)                                             # (1, 1) -> SMEM

    flops = 2 * B * NI * H2 + 2 * 2 * B * H * H + 2 * B * H
    transcendentals = 4 * B * H
    bytes_accessed = (
        B * NI * x.dtype.itemsize                       # x read (stored dtype)
        + (NI * H2 + 2 * H * H) * 2                     # bf16 weights (resident)
        + (H2 + 2 * H + H) * 4 + 4                      # biases + clw + clb (f32)
        + B * 4 + B * H * jnp.dtype(actor_dtype).itemsize   # value + actor writeback
    )

    kernel = functools.partial(_mlp_base_kernel, hidden_size=H,
                               tanh_bf16=cfg["tanh_bf16"])

    value, actor = pl.pallas_call(
        kernel,
        out_shape=(
            jax.ShapeDtypeStruct((B, 1), jnp.float32),
            jax.ShapeDtypeStruct((B, H), actor_dtype),
        ),
        grid_spec=pltpu.PrefetchScalarGridSpec(
            num_scalar_prefetch=0,
            grid=(G,),
            in_specs=[
                pl.BlockSpec((TB, NI), lambda i: (i, 0)),          # x: streamed per tile
                pl.BlockSpec((NI, H2), lambda i: (0, 0)),          # fused W1: VMEM-resident
                pl.BlockSpec((1, H2), lambda i: (0, 0)),           # fused b1
                pl.BlockSpec((H, H), lambda i: (0, 0)),            # actor W2
                pl.BlockSpec((1, H), lambda i: (0, 0)),            # actor b2
                pl.BlockSpec((H, H), lambda i: (0, 0)),            # critic W2
                pl.BlockSpec((1, H), lambda i: (0, 0)),            # critic b2
                pl.BlockSpec((1, H), lambda i: (0, 0)),            # critic_linear weight row
                pl.BlockSpec(memory_space=pltpu.MemorySpace.SMEM), # critic_linear bias scalar
            ],
            out_specs=(
                pl.BlockSpec((TB, 1), lambda i: (i, 0)),           # value
                pl.BlockSpec((TB, H), lambda i: (i, 0)),           # hidden_actor (bf16)
            ),
        ),
        compiler_params=pltpu.CompilerParams(
            dimension_semantics=("parallel",),
            vmem_limit_bytes=cfg["vmem_limit"],
        ),
        cost_estimate=pl.CostEstimate(
            flops=flops,
            transcendentals=transcendentals,
            bytes_accessed=bytes_accessed,
        ),
    )(x, w1, b1, w2a, b2a, w2c, b2c, clw, clb)

    return value, actor, rnn_hxs


def init_mlp_base_params(key, num_inputs, hidden_size):
    """Orthogonal weights with gain sqrt(2), zero biases (matches the PyTorch
    init_ helper).  Weights stored as (in, out) so the kernel computes x @ W + b."""
    gain = math.sqrt(2.0)
    ortho = jax.nn.initializers.orthogonal(scale=gain)
    ks = jax.random.split(key, 5)
    return {
        "aw1": ortho(ks[0], (num_inputs, hidden_size), jnp.float32),
        "ab1": jnp.zeros((1, hidden_size), jnp.float32),
        "aw2": ortho(ks[1], (hidden_size, hidden_size), jnp.float32),
        "ab2": jnp.zeros((1, hidden_size), jnp.float32),
        "cw1": ortho(ks[2], (num_inputs, hidden_size), jnp.float32),
        "cb1": jnp.zeros((1, hidden_size), jnp.float32),
        "cw2": ortho(ks[3], (hidden_size, hidden_size), jnp.float32),
        "cb2": jnp.zeros((1, hidden_size), jnp.float32),
        "clw": ortho(ks[4], (hidden_size, 1), jnp.float32),
        "clb": jnp.zeros((1, 1), jnp.float32),
    }


def _reference_forward_f32(x, params, rnn_hxs):
    """Exact f32 module semantics."""
    ha = jnp.tanh(x @ params["aw1"] + params["ab1"])
    ha = jnp.tanh(ha @ params["aw2"] + params["ab2"])
    hc = jnp.tanh(x @ params["cw1"] + params["cb1"])
    hc = jnp.tanh(hc @ params["cw2"] + params["cb2"])
    value = hc @ params["clw"] + params["clb"]
    return value, ha, rnn_hxs


def _reference_forward_bf16(x, params, rnn_hxs, tanh_bf16):
    """Reference matching the kernel's precision policy: bf16 matmul inputs,
    f32 accumulation, optional bf16 layer-1 tanh, f32 layer-2 tanh."""
    bf16 = jnp.bfloat16

    def lin(h, w, b):
        return jnp.dot(h.astype(bf16), w.astype(bf16),
                       preferred_element_type=jnp.float32) + b

    def act1(pre):
        if tanh_bf16:
            return jnp.tanh(pre.astype(bf16)).astype(jnp.float32)
        return jnp.tanh(pre)

    ha = act1(lin(x, params["aw1"], params["ab1"]))
    ha = jnp.tanh(lin(ha, params["aw2"], params["ab2"]))
    hc = act1(lin(x, params["cw1"], params["cb1"]))
    hc = jnp.tanh(lin(hc, params["cw2"], params["cb2"]))
    value = hc @ params["clw"] + params["clb"]
    return value, ha, rnn_hxs


if __name__ == "__main__":
    # TODO(synk): recurrent=True path (GRU) not implemented; module default is recurrent=False.
    B, NUM_INPUTS, HIDDEN = 2, 16, 32

    key = jax.random.PRNGKey(0)
    k_x, k_p = jax.random.split(key)

    x = jax.random.normal(k_x, (B, NUM_INPUTS), dtype=jnp.float32)
    rnn_hxs = jnp.zeros((B, 1), dtype=jnp.float32)   # recurrent_hidden_state_size == 1
    masks = jnp.ones((B, 1), dtype=jnp.float32)      # unused in the non-recurrent path

    params = init_mlp_base_params(k_p, NUM_INPUTS, HIDDEN)

    value, hidden_actor, rnn_hxs_out = mlp_base_forward(x, params, rnn_hxs)
    jax.block_until_ready((value, hidden_actor, rnn_hxs_out))

    assert value.shape == (B, 1) and value.dtype == jnp.float32
    assert hidden_actor.shape == (B, HIDDEN)

    # Check against a reference matching the kernel's reduced-precision policy.
    tanh_bf16 = _kernel_config()["tanh_bf16"]
    v_bf, a_bf, _ = _reference_forward_bf16(x, params, rnn_hxs, tanh_bf16)
    actor_f32 = hidden_actor.astype(jnp.float32)
    assert jnp.allclose(value, v_bf, atol=2e-2, rtol=2e-2)
    assert jnp.allclose(actor_f32, a_bf, atol=2e-2, rtol=2e-2)

    # Loose sanity check against exact f32 module semantics.
    v_f32, a_f32, _ = _reference_forward_f32(x, params, rnn_hxs)
    assert jnp.allclose(value, v_f32, atol=0.1, rtol=0.1)
    assert jnp.allclose(actor_f32, a_f32, atol=0.1, rtol=0.1)

    print("KERNEL_OK")
</pallas_src>

<mosaic_0001>
module attributes {stable_mosaic.version = 11 : i64} {
  func.func @_mlp_base_kernel(%arg0: i32, %arg1: memref<2x16xf32, #tpu.memory_space<vmem>>, %arg2: memref<16x64xbf16, #tpu.memory_space<vmem>>, %arg3: memref<1x64xf32, #tpu.memory_space<vmem>>, %arg4: memref<32x32xbf16, #tpu.memory_space<vmem>>, %arg5: memref<1x32xf32, #tpu.memory_space<vmem>>, %arg6: memref<32x32xbf16, #tpu.memory_space<vmem>>, %arg7: memref<1x32xf32, #tpu.memory_space<vmem>>, %arg8: memref<1x32xf32, #tpu.memory_space<vmem>>, %arg9: memref<1x1xf32, #tpu.memory_space<smem>>, %arg10: memref<2x1xf32, #tpu.memory_space<vmem>>, %arg11: memref<2x32xbf16, #tpu.memory_space<vmem>>) attributes {dimension_semantics = [#tpu.dimension_semantics<parallel>], iteration_bounds = array<i64: 1>, scalar_prefetch = 0 : i64, scratch_operands = 0 : i64, tpu.core_type = #tpu.core_type<tc>, window_params = [{transform_indices = @transform_0, window_bounds = array<i64: 2, 16>}, {pipeline_mode = #tpu.pipeline_mode<synchronous>, transform_indices = @transform_1, window_bounds = array<i64: 16, 64>}, {pipeline_mode = #tpu.pipeline_mode<synchronous>, transform_indices = @transform_2, window_bounds = array<i64: 1, 64>}, {pipeline_mode = #tpu.pipeline_mode<synchronous>, transform_indices = @transform_3, window_bounds = array<i64: 32, 32>}, {pipeline_mode = #tpu.pipeline_mode<synchronous>, transform_indices = @transform_4, window_bounds = array<i64: 1, 32>}, {pipeline_mode = #tpu.pipeline_mode<synchronous>, transform_indices = @transform_5, window_bounds = array<i64: 32, 32>}, {pipeline_mode = #tpu.pipeline_mode<synchronous>, transform_indices = @transform_6, window_bounds = array<i64: 1, 32>}, {pipeline_mode = #tpu.pipeline_mode<synchronous>, transform_indices = @transform_7, window_bounds = array<i64: 1, 32>}, {transform_indices = @transform_8, window_bounds = array<i64: 1, 1>}, {transform_indices = @transform_9, window_bounds = array<i64: 2, 1>}, {transform_indices = @transform_10, window_bounds = array<i64: 2, 32>}]} {
    %c0 = arith.constant 0 : index
    %c0_0 = arith.constant 0 : index
    %0 = vector.load %arg1[%c0, %c0_0] : memref<2x16xf32, #tpu.memory_space<vmem>>, vector<2x16xf32>
    %1 = arith.truncf %0 : vector<2x16xf32> to vector<2x16xbf16>
    %c0_1 = arith.constant 0 : index
    %c0_2 = arith.constant 0 : index
    %2 = vector.load %arg2[%c0_1, %c0_2] : memref<16x64xbf16, #tpu.memory_space<vmem>>, vector<16x64xbf16>
    %cst = arith.constant dense<0.000000e+00> : vector<2x64xf32>
    %3 = tpu.matmul %1, %2, %cst {dimension_numbers = #tpu.dot_dimension_numbers<[1], [0], [0], [1], [0, 0, 1, 1], [], []>} : vector<2x16xbf16>, vector<16x64xbf16>, vector<2x64xf32> -> vector<2x64xf32>
    %c0_3 = arith.constant 0 : index
    %c0_4 = arith.constant 0 : index
    %4 = vector.load %arg3[%c0_3, %c0_4] : memref<1x64xf32, #tpu.memory_space<vmem>>, vector<1x64xf32>
    %5 = vector.broadcast %4 : vector<1x64xf32> to vector<2x64xf32>
    %6 = arith.addf %3, %5 : vector<2x64xf32>
    %7 = vector.extract_strided_slice %6 {offsets = [0, 0], sizes = [2, 32], strides = [1, 1]} : vector<2x64xf32> to vector<2x32xf32>
    %8 = vector.extract_strided_slice %6 {offsets = [0, 32], sizes = [2, 32], strides = [1, 1]} : vector<2x64xf32> to vector<2x32xf32>
    %9 = math.tanh %7 : vector<2x32xf32>
    %10 = arith.truncf %9 : vector<2x32xf32> to vector<2x32xbf16>
    %11 = math.tanh %8 : vector<2x32xf32>
    %12 = arith.truncf %11 : vector<2x32xf32> to vector<2x32xbf16>
    %c0_5 = arith.constant 0 : index
    %c0_6 = arith.constant 0 : index
    %13 = vector.load %arg4[%c0_5, %c0_6] : memref<32x32xbf16, #tpu.memory_space<vmem>>, vector<32x32xbf16>
    %cst_7 = arith.constant dense<0.000000e+00> : vector<2x32xf32>
    %14 = tpu.matmul %10, %13, %cst_7 {dimension_numbers = #tpu.dot_dimension_numbers<[1], [0], [0], [1], [0, 0, 1, 1], [], []>} : vector<2x32xbf16>, vector<32x32xbf16>, vector<2x32xf32> -> vector<2x32xf32>
    %c0_8 = arith.constant 0 : index
    %c0_9 = arith.constant 0 : index
    %15 = vector.load %arg5[%c0_8, %c0_9] : memref<1x32xf32, #tpu.memory_space<vmem>>, vector<1x32xf32>
    %16 = vector.broadcast %15 : vector<1x32xf32> to vector<2x32xf32>
    %17 = arith.addf %14, %16 : vector<2x32xf32>
    %18 = math.tanh %17 : vector<2x32xf32>
    %c0_10 = arith.constant 0 : index
    %c0_11 = arith.constant 0 : index
    %19 = vector.load %arg6[%c0_10, %c0_11] : memref<32x32xbf16, #tpu.memory_space<vmem>>, vector<32x32xbf16>
    %cst_12 = arith.constant dense<0.000000e+00> : vector<2x32xf32>
    %20 = tpu.matmul %12, %19, %cst_12 {dimension_numbers = #tpu.dot_dimension_numbers<[1], [0], [0], [1], [0, 0, 1, 1], [], []>} : vector<2x32xbf16>, vector<32x32xbf16>, vector<2x32xf32> -> vector<2x32xf32>
    %c0_13 = arith.constant 0 : index
    %c0_14 = arith.constant 0 : index
    %21 = vector.load %arg7[%c0_13, %c0_14] : memref<1x32xf32, #tpu.memory_space<vmem>>, vector<1x32xf32>
    %22 = vector.broadcast %21 : vector<1x32xf32> to vector<2x32xf32>
    %23 = arith.addf %20, %22 : vector<2x32xf32>
    %24 = math.tanh %23 : vector<2x32xf32>
    %25 = arith.truncf %18 : vector<2x32xf32> to vector<2x32xbf16>
    %c0_15 = arith.constant 0 : index
    %c0_16 = arith.constant 0 : index
    %26 = vector.load %arg11[%c0_15, %c0_16] : memref<2x32xbf16, #tpu.memory_space<vmem>>, vector<2x32xbf16>
    tpu.vector_store %arg11[%c0_15, %c0_16], %25 {strides = array<i32>} : memref<2x32xbf16, #tpu.memory_space<vmem>>, vector<2x32xbf16>,
    %c0_17 = arith.constant 0 : index
    %c0_18 = arith.constant 0 : index
    %27 = vector.load %arg8[%c0_17, %c0_18] : memref<1x32xf32, #tpu.memory_space<vmem>>, vector<1x32xf32>
    %28 = vector.broadcast %27 : vector<1x32xf32> to vector<2x32xf32>
    %29 = arith.mulf %24, %28 : vector<2x32xf32>
    %cst_19 = arith.constant dense<0.000000e+00> : vector<2xf32>
    %30 = vector.multi_reduction <add>, %29, %cst_19 [1] : vector<2x32xf32> to vector<2xf32>
    %31 = vector.shape_cast %30 : vector<2xf32> to vector<2x1xf32>
    %c0_20 = arith.constant 0 : index
    %c0_21 = arith.constant 0 : index
    %32 = memref.load %arg9[%c0_20, %c0_21] : memref<1x1xf32, #tpu.memory_space<smem>>
    %33 = vector.broadcast %32 : f32 to vector<2x1xf32>
    %34 = arith.addf %31, %33 : vector<2x1xf32>
    %c0_22 = arith.constant 0 : index
    %c0_23 = arith.constant 0 : index
    %35 = vector.load %arg10[%c0_22, %c0_23] : memref<2x1xf32, #tpu.memory_space<vmem>>, vector<2x1xf32>
    tpu.vector_store %arg10[%c0_22, %c0_23], %34 {strides = array<i32>} : memref<2x1xf32, #tpu.memory_space<vmem>>, vector<2x1xf32>,
    return
  }
  func.func @transform_0(%arg0: i32) -> (i32, i32) {
    %c0_i32 = arith.constant 0 : i32
    %c0_i32_0 = arith.constant 0 : i32
    return %arg0, %c0_i32 : i32, i32
  }
  func.func @transform_1(%arg0: i32) -> (i32, i32) {
    %c0_i32 = arith.constant 0 : i32
    %c0_i32_0 = arith.constant 0 : i32
    %c0_i32_1 = arith.constant 0 : i32
    return %c0_i32, %c0_i32_0 : i32, i32
  }
  func.func @transform_2(%arg0: i32) -> (i32, i32) {
    %c0_i32 = arith.constant 0 : i32
    %c0_i32_0 = arith.constant 0 : i32
    %c0_i32_1 = arith.constant 0 : i32
    return %c0_i32, %c0_i32_0 : i32, i32
  }
  func.func @transform_3(%arg0: i32) -> (i32, i32) {
    %c0_i32 = arith.constant 0 : i32
    %c0_i32_0 = arith.constant 0 : i32
    %c0_i32_1 = arith.constant 0 : i32
    return %c0_i32, %c0_i32_0 : i32, i32
  }
  func.func @transform_4(%arg0: i32) -> (i32, i32) {
    %c0_i32 = arith.constant 0 : i32
    %c0_i32_0 = arith.constant 0 : i32
    %c0_i32_1 = arith.constant 0 : i32
    return %c0_i32, %c0_i32_0 : i32, i32
  }
  func.func @transform_5(%arg0: i32) -> (i32, i32) {
    %c0_i32 = arith.constant 0 : i32
    %c0_i32_0 = arith.constant 0 : i32
    %c0_i32_1 = arith.constant 0 : i32
    return %c0_i32, %c0_i32_0 : i32, i32
  }
  func.func @transform_6(%arg0: i32) -> (i32, i32) {
    %c0_i32 = arith.constant 0 : i32
    %c0_i32_0 = arith.constant 0 : i32
    %c0_i32_1 = arith.constant 0 : i32
    return %c0_i32, %c0_i32_0 : i32, i32
  }
  func.func @transform_7(%arg0: i32) -> (i32, i32) {
    %c0_i32 = arith.constant 0 : i32
    %c0_i32_0 = arith.constant 0 : i32
    %c0_i32_1 = arith.constant 0 : i32
    return %c0_i32, %c0_i32_0 : i32, i32
  }
  func.func @transform_8(%arg0: i32) -> (i32, i32) {
    %c0_i32 = arith.constant 0 : i32
    %c0_i32_0 = arith.constant 0 : i32
    %c0_i32_1 = arith.constant 0 : i32
    return %c0_i32, %c0_i32_0 : i32, i32
  }
  func.func @transform_9(%arg0: i32) -> (i32, i32) {
    %c0_i32 = arith.constant 0 : i32
    %c0_i32_0 = arith.constant 0 : i32
    return %arg0, %c0_i32 : i32, i32
  }
  func.func @transform_10(%arg0: i32) -> (i32, i32) {
    %c0_i32 = arith.constant 0 : i32
    %c0_i32_0 = arith.constant 0 : i32
    return %arg0, %c0_i32 : i32, i32
  }
}

</mosaic_0001>

<bundles_post_ra>
// kernel: mlp_base_forward.1
= control target key start
LH: loop header
LB: loop body
LE: loop exit
PB: predicated region body
PF: predicated region fallthrough
CT: control target
= control target key end

     0   :  { %v357_v1 = vmov 0.0   ;;  %vm54_vm0 = vcmask 130048   ;;  %vm358_vm1 = vmmov 0   ;;  %s464_s0 = inlined_call_operand.vmem [shape: f32[2,16], index: 0, kind: input, shape index: {}]   ;;  %s465_s1 = inlined_call_operand.vmem [shape: bf16[16,64], index: 1, kind: input, shape index: {}]   ;;  %s466_s2 = inlined_call_operand.vmem [shape: f32[1,64], index: 2, kind: input, shape index: {}]   ;;  %s467_s3 = inlined_call_operand.vmem [shape: bf16[32,32], index: 3, kind: input, shape index: {}]   ;;  %s468_s4 = inlined_call_operand.vmem [shape: f32[1,32], index: 4, kind: input, shape index: {}]   ;;  %s469_s5 = inlined_call_operand.vmem [shape: bf16[32,32], index: 5, kind: input, shape index: {}]   ;;  %s470_s6 = inlined_call_operand.vmem [shape: f32[1,32], index: 6, kind: input, shape index: {}]   ;;  %s471_s7 = inlined_call_operand.vmem [shape: f32[1,32], index: 7, kind: input, shape index: {}]   ;;  %s472_s8 = inlined_call_operand.<no memory space> [shape: f32[1,1], index: 8, kind: input, shape index: {}]   ;;  %s473_s9 = inlined_call_operand.vmem [shape: f32[2,1], index: 9, kind: output, shape index: {0}]   ;;  %s474_s10 = inlined_call_operand.hbm [shape: bf16[2,32], index: 10, kind: output, shape index: {1}]  }
   0x1   :  { %v322_v0 = vld [vmem:[%s465_s1] sm:$0xff]   ;;  %296 = vmatprep.subr.bf16.mxu0 %v357_v1  ;;  %302 = vmatprep.subr.bf16.mxu1 %v357_v1 }
   0x2   :  { %v37_v2 = vld [vmem:[%s464_s0] sm:$0x3]  ;;  %297 = vmatpush3.bf16.msra.mxu0 %v322_v0  ;;  %298 = vmatprep.mubr.msk.bf16.mxu0 %vm358_vm1, %v357_v1 }
   0x3   :  { %v38_v3 = vpack.c.bf16 %v37_v2, %v37_v2  ;;  %306 = vmatprep.mubr.msk.bf16.mxu1 %vm358_vm1, %v357_v1  ;;  %310 = vmatprep.subr.bf16.mxu0 %v357_v1 }
   0x4   :  { %17 = vsyncpa [#allocation4], 0  ;;  %v323_v4 = vld [vmem:[%s467_s3] sm:$0xff]   ;;  %v324_v5 = vld [vmem:[%s467_s3 + $0x8] sm:$0xff]   ;;  %vm123_vm2 = vcmask 261120   ;;  %s359_s3 = smov 96  }
   0x5   :  { %299 = vmatmul.mubr.msk.bf16.vlgmr.msra.gmra.mrb[0].mxu0 %vm54_vm0, %v38_v3  ;;  %303 = vmatpush3.bf16.msra.mxu1 %v323_v4  ;;  %v325_v6 = vld [vmem:[%s469_s5] sm:$0xff]   ;;  %v326_v7 = vld [vmem:[%s469_s5 + $0x8] sm:$0xff]   ;;  %vm239_vm3 = vcmask 253952   ;;  %vm249_vm4 = vcmask 254976   ;;  %s360_s28 = smov [#allocation3]  }
   0x6   :  { %314 = vmatprep.mubr.msk.bf16.mxu0 %vm358_vm1, %v357_v1  ;;  %304 = vmatprep.subr.bf16.mxu1 %v357_v1  ;;  %v276_v8 = vld [vmem:[%s466_s2] ss:$0 sm:$0xff]  ;;  %s266_s29 = sshll.u32 %s360_s28, 4  ;;  %s267_s29 = int_to_ptr.vmem [resolvable:$true] %s266_s29 }
   0x7   :  { %311 = vmatpush3.bf16.msra.mxu0 %v325_v6  ;;  %v279_v17 = vld [vmem:[%s468_s4] ss:$0 sm:$0xff]  ;;  %s333_s30 = scalar_lea.vmem %s267_s29, 16  ;;  %p338_p1 = scmp.lt.s32.totalorder %s267_s29, %s267_s29 }
   0x8   :  { %312 = vmatprep.subr.bf16.mxu0 %v357_v1  ;;  %v283_v25 = vld [vmem:[%s470_s6] ss:$0 sm:$0xff]  ;;  %p334_p0 = scmp.ne.s32.totalorder %s267_s29, %s333_s30  ;;  %s337_s6 = scalar_lea.vmem %s267_s29, 32 }
   0x9   :  { %305 = vmatpush3.bf16.msra.mxu1 %v324_v5  ;;  %v287_v31 = vld [vmem:[%s471_s7] ss:$0 sm:$0xff]  ;;  %p339_p2 = scmp.lt.s32.totalorder %s337_s6, %s333_s30 }
   0xb   :  { %313 = vmatpush3.bf16.msra.mxu0 %v326_v7  ;;  %p340_p3 = por %p339_p2, %p338_p1 }
   0xd   :  { %p341_p4 = pnand %p340_p3, %p334_p0 }
  0xd8   :  { %v92_v9 = vpop.f32.mrb[0].mxu0 }
  0xd9   :  { %v93_v10 = vadd.f32 %v276_v8, %v92_v9  ;;  %v300_v11 = vpop.f32.mrb[1].mxu0 }
  0xda   :  { %v95_v12 = vpop.f32.mrb[2].mxu0 }
  0xdb   :  { %327 = vtanh.f32 %v93_v10  ;;  %v301_v13 = vpop.f32.mrb[3].mxu0 }
  0xe5   :  { %v328_v14 = vpop.eup %327 }
  0xe6   :  { %v99_v15 = vpack.c.bf16 %v328_v14, %v328_v14 }
  0xe8   :  { %180 = vrot.lane.b32.xlu0 %v99_v15, %s359_s3  ;;  %307 = vmatmul.mubr.msk.bf16.vlgmr.msra.gmra.mrb[0].mxu1 %vm123_vm2, %v99_v15 }
 0x15a   :  { %v181_v16 = vpop.permute.xlu0 %180 }
 0x15b   :  { %315 = vmatmul.mubr.msk.bf16.vlgmr.msra.gmra.mrb[4].mxu0 %vm123_vm2, %v181_v16 }
 0x1bb   :  { %v161_v18 = vpop.f32.mrb[0].mxu1 }
 0x1bc   :  { %v162_v19 = vadd.f32 %v279_v17, %v161_v18  ;;  %v308_v20 = vpop.f32.mrb[1].mxu1 }
 0x1bd   :  { %v164_v21 = vpop.f32.mrb[2].mxu1 }
 0x1be   :  { %329 = vtanh.f32 %v162_v19  ;;  %v309_v22 = vpop.f32.mrb[3].mxu1 }
 0x1c8   :  { %v330_v23 = vpop.eup %329 }
 0x1c9   :  { %v238_v24 = vpack.c.bf16 %v330_v23, %v330_v23 }
 0x1cb   :  { %240 = vst.msk [vmem:[#allocation3] sm:$0x1] %vm239_vm3, %v238_v24 }
 0x22e   :  { %v231_v26 = vpop.f32.mrb[4].mxu0 }
 0x22f   :  { %v232_v27 = vadd.f32 %v283_v25, %v231_v26  ;;  %v316_v28 = vpop.f32.mrb[5].mxu0 }
 0x230   :  { %v234_v29 = vpop.f32.mrb[6].mxu0 }
 0x231   :  { %331 = vtanh.f32 %v232_v27  ;;  %v317_v30 = vpop.f32.mrb[7].mxu0 }
 0x23b   :  { %v332_v32 = vpop.eup %331 }
 0x23c   :  { %v248_v33 = vmul.f32 %v332_v32, %v287_v31 }
 0x23e   :  { %v250_v34 = vsel %vm249_vm4, %v248_v33, 0.0 }
 0x23f   :  { %251 = vadd.xlane.f32.xlu0 %v250_v34 }
 0x240   :  { %344 = shalt.err (!%p341_p4)
}
 0x241   :  { %s345_s7 = scalar_lea.hbm %s474_s10, 16 }
 0x242   :  { %p346_p5 = scmp.ne.s32.totalorder %s474_s10, %s345_s7  ;;  %p349_p6 = scmp.lt.u32.totalorder %s345_s7, %s474_s10 }
 0x244   :  { %p351_p7 = pnand %p349_p6, %p346_p5 }
 0x246   :  { %354 = shalt.err (!%p351_p7)
}
 0x247   :  { %269 = dma.vmem_to_hbm [thread:$0]  %s267_s29, 16, %s474_s10, [#allocation4]   ;;  %v254_v35 = vstv %s472_s8  ;;  %vm256_vm5 = vcmask 1024  }
 0x2cc   :  { %v252_v36 = vpop.xlane.xlu0 %251 }
 0x2cd   :  { %v255_v37 = vadd.f32 %v254_v35, %v252_v36 }
 0x2cf   :  { %257 = vst.msk [vmem:[%s473_s9] sm:$0x3] %vm256_vm5, %v255_v37 }
 0x2d0   :  { %355 = dma.done.wait [#allocation4], 16  }
 0x2d1   :  { %356 = vsyncadd [#allocation4], 4294967280 }
 0x2d2   :  { %275 = vsyncpa [#allocation4], 1 }

</bundles_post_ra>
